<compile_context>
chip_gen: v5e
topology: v5e:2x2
jax: 0.10.0
libtpu: 0.0.40
codegen_flags: <defaults>
</compile_context>

<pallas_src>
import numpy as np
import jax
import jax.numpy as jnp
from jax.experimental import pallas as pl
from jax.experimental.pallas import tpu as pltpu

# --------------------------------------------------------------------------
# problem sizes (small, synthetic)
# --------------------------------------------------------------------------
N_NODES = 12          # graph nodes
N_BANK = 2            # bank rows (vstack'ed onto node outputs)
N_TOT = N_NODES + N_BANK
F_IN, F_H1, F_H2 = 27, 60, 50
F_FC1, F_FC2, F_OUT = 40, 20, 1

# packed static-constant buffer: one (32,128) f32 tile, 8-row-aligned regions
P_ROWS, P_COLS = 32, 128
R_V = 0          # row 0      : v      = W1 @ W2 @ W_head         (lanes 0..26)
R_WB = 1         # row 1      : w_bank = Wb @ W_head              (lanes 0..26)
R_A2T = 8        # rows 8..19 : (Ahat @ Ahat)^T  -> logits lanes 0..11
R_EYE = 20       # rows 20..21: one-hot rows placing bank logits at lanes 12,13
R_CVEC = 24      # row 24     : folded additive constants (lanes 0..13),
                 #              -1e30 softmax mask in lanes 14..127
NEG_MASK = -1e30

HIGHEST = jax.lax.Precision.HIGHEST


def _dot(a, b):
    # exact f32 matmul for init-time folding and for the unfolded reference
    return jnp.dot(a, b, precision=HIGHEST, preferred_element_type=jnp.float32)


# --------------------------------------------------------------------------
# Pallas kernel: whole forward pass (VPU / XLU / EUP only -- no MXU pushes)
# --------------------------------------------------------------------------
def node_predictor_kernel(x_ref, bank_ref, p_ref, out_ref):
    x = x_ref[...]                                     # (12, 27) node features
    bank = bank_ref[...]                               # (2, 27)  bank features

    v_row = p_ref[R_V:R_V + 1, 0:F_IN]                 # (1, 27)
    wb_row = p_ref[R_WB:R_WB + 1, 0:F_IN]              # (1, 27)
    a2t = p_ref[R_A2T:R_A2T + N_NODES, :]              # (12, 128) (Ahat@Ahat)^T
    eye_b = p_ref[R_EYE:R_EYE + N_BANK, :]             # (2, 128)  bank lane placement
    cvec = p_ref[R_CVEC:R_CVEC + 1, :]                 # (1, 128)  consts + -1e30 mask

    # folded 27->1 projections: VPU multiply + XLU lane reduce
    pre_n = jnp.sum(x * v_row, axis=-1, keepdims=True)      # (12, 1)
    pre_b = jnp.sum(bank * wb_row, axis=-1, keepdims=True)  # (2, 1)

    # folded two-hop aggregation, transposed so logits land lane-dense;
    # bank rows pass through via one-hot rows (keeps the matvec off the MXU)
    logits = (jnp.sum(pre_n * a2t, axis=0, keepdims=True)
              + jnp.sum(pre_b * eye_b, axis=0, keepdims=True)
              + cvec)                                        # (1, 128)

    # softmax over dim 0 of the original (14,1) == lane softmax here;
    # masked lanes are -1e30 so exp underflows to exactly 0
    m = jnp.max(logits)
    e = jnp.exp(logits - m)
    out_ref[...] = e * (1.0 / jnp.sum(e))              # single full-lane store


# --------------------------------------------------------------------------
# one-time folding of parameters + static graph into one lane-aligned buffer
# --------------------------------------------------------------------------
def fold_static(params, adj):
    (w1, b1, w2, b2, wb, bb, wf1, bf1, wf2, bf2, wf3, bf3) = params

    w_head = _dot(_dot(wf1, wf2), wf3)                  # (50, 1)
    b_head = _dot(_dot(bf1, wf2) + bf2, wf3) + bf3      # (1, 1)
    w2h = _dot(w2, w_head)                              # (60, 1)
    c_node = (_dot(b2, w_head) + b_head)[0, 0]          # scalar
    v = _dot(w1, w2h)                                   # (27, 1)
    c1 = _dot(b1, w2h)[0, 0]                            # scalar
    w_bank = _dot(wb, w_head)                           # (27, 1)
    c_bank = (_dot(bb, w_head) + b_head)[0, 0]          # scalar

    a2 = _dot(adj, adj)                                 # (12, 12) two-hop Ahat
    cvec_node = c1 * jnp.sum(adj, axis=1) + c_node      # (12,)

    p = jnp.zeros((P_ROWS, P_COLS), jnp.float32)
    p = p.at[R_V, 0:F_IN].set(v[:, 0])
    p = p.at[R_WB, 0:F_IN].set(w_bank[:, 0])
    p = p.at[R_A2T:R_A2T + N_NODES, 0:N_NODES].set(a2.T)
    p = p.at[R_EYE, N_NODES].set(1.0)
    p = p.at[R_EYE + 1, N_NODES + 1].set(1.0)
    p = p.at[R_CVEC, :].set(jnp.full((P_COLS,), NEG_MASK, jnp.float32))
    p = p.at[R_CVEC, 0:N_NODES].set(cvec_node)
    p = p.at[R_CVEC, N_NODES:N_TOT].set(c_bank)
    return p


# --------------------------------------------------------------------------
# wrapper: the jitted forward is EXACTLY one pallas_call (no XLA glue ops)
# --------------------------------------------------------------------------
@jax.jit
def node_predictor_forward(x, bank, packed):
    vmem = pl.BlockSpec(memory_space=pltpu.MemorySpace.VMEM)
    return pl.pallas_call(
        node_predictor_kernel,
        out_shape=jax.ShapeDtypeStruct((1, P_COLS), jnp.float32),
        in_specs=[vmem, vmem, vmem],
        out_specs=vmem,
    )(x, bank, packed)


# --------------------------------------------------------------------------
# init-time glue: dense normalized adjacency (GCNConv: self-loops + sym norm)
# --------------------------------------------------------------------------
def build_norm_adj(edge_index, num_nodes):
    src, dst = edge_index[0], edge_index[1]
    loop = jnp.arange(num_nodes)
    src = jnp.concatenate([src, loop])
    dst = jnp.concatenate([dst, loop])
    a = jnp.zeros((num_nodes, num_nodes), jnp.float32).at[dst, src].add(1.0)
    deg = a.sum(axis=1)                        # in-degree incl. self-loop
    dinv = 1.0 / jnp.sqrt(deg)
    return dinv[:, None] * a * dinv[None, :]   # Ahat[i, j] = d_i^-1/2 d_j^-1/2


# --------------------------------------------------------------------------
# pure-JAX reference: the ORIGINAL (unfolded) math, for correctness check
# --------------------------------------------------------------------------
def reference_forward(adj, x, bank, params):
    (w1, b1, w2, b2, wb, bb, wf1, bf1, wf2, bf2, wf3, bf3) = params
    h = _dot(adj, _dot(x, w1)) + b1
    h = _dot(adj, _dot(h, w2)) + b2
    bk = _dot(bank, wb) + bb
    z = jnp.concatenate([h, bk], axis=0)
    z = _dot(z, wf1) + bf1
    z = _dot(z, wf2) + bf2
    z = _dot(z, wf3) + bf3
    return jax.nn.softmax(z, axis=0)


# --------------------------------------------------------------------------
if __name__ == "__main__":
    key = jax.random.PRNGKey(0)
    ks = jax.random.split(key, 16)

    # deterministic synthetic parameters (shapes from the module __init__)
    def init(k, shape, scale=0.1):
        return (scale * jax.random.normal(k, shape)).astype(jnp.float32)

    w1 = init(ks[0], (F_IN, F_H1));    b1 = init(ks[1], (1, F_H1))
    w2 = init(ks[2], (F_H1, F_H2));    b2 = init(ks[3], (1, F_H2))
    wb = init(ks[4], (F_IN, F_H2));    bb = init(ks[5], (1, F_H2))
    wf1 = init(ks[6], (F_H2, F_FC1));  bf1 = init(ks[7], (1, F_FC1))
    wf2 = init(ks[8], (F_FC1, F_FC2)); bf2 = init(ks[9], (1, F_FC2))
    wf3 = init(ks[10], (F_FC2, F_OUT)); bf3 = init(ks[11], (1, F_OUT))
    params = (w1, b1, w2, b2, wb, bb, wf1, bf1, wf2, bf2, wf3, bf3)

    # deterministic inputs: node features, bank features, a small directed graph
    x = init(ks[12], (N_NODES, F_IN), scale=1.0)
    bank = init(ks[13], (N_BANK, F_IN), scale=1.0)

    src = np.array([0, 1, 2, 3, 4, 5, 6, 7, 8, 9, 10, 11, 0, 3, 6, 9, 2, 5],
                   dtype=np.int32)
    dst = np.array([1, 2, 3, 4, 5, 6, 7, 8, 9, 10, 11, 0, 6, 9, 0, 3, 8, 11],
                   dtype=np.int32)
    edge_index = jnp.stack([jnp.asarray(src), jnp.asarray(dst)], axis=0)

    adj = build_norm_adj(edge_index, N_NODES)

    # one-time, amortized at init (graph + parameters are static across calls)
    packed = jax.block_until_ready(fold_static(params, adj))

    out = node_predictor_forward(x, bank, packed)
    out = jax.block_until_ready(out)

    ref = jax.block_until_ready(reference_forward(adj, x, bank, params))

    out_np = np.asarray(out)
    assert out_np.shape == (1, P_COLS)
    np.testing.assert_allclose(out_np[0, :N_TOT], np.asarray(ref)[:, 0],
                               rtol=1e-5, atol=1e-6)
    np.testing.assert_allclose(out_np[0, N_TOT:], 0.0, atol=1e-20)

    print("KERNEL_OK")
</pallas_src>

<mosaic_0001>
module attributes {stable_mosaic.version = 11 : i64} {
  func.func @node_predictor_kernel(%arg0: memref<12x27xf32, #tpu.memory_space<vmem>>, %arg1: memref<2x27xf32, #tpu.memory_space<vmem>>, %arg2: memref<32x128xf32, #tpu.memory_space<vmem>>, %arg3: memref<1x128xf32, #tpu.memory_space<vmem>>) attributes {dimension_semantics = [], scalar_prefetch = 0 : i64, scratch_operands = 0 : i64, tpu.core_type = #tpu.core_type<tc>} {
    %c0 = arith.constant 0 : index
    %c0_0 = arith.constant 0 : index
    %0 = vector.load %arg0[%c0, %c0_0] : memref<12x27xf32, #tpu.memory_space<vmem>>, vector<12x27xf32>
    %c0_1 = arith.constant 0 : index
    %c0_2 = arith.constant 0 : index
    %1 = vector.load %arg1[%c0_1, %c0_2] : memref<2x27xf32, #tpu.memory_space<vmem>>, vector<2x27xf32>
    %c0_3 = arith.constant 0 : index
    %c0_4 = arith.constant 0 : index
    %2 = vector.load %arg2[%c0_3, %c0_4] : memref<32x128xf32, #tpu.memory_space<vmem>>, vector<1x27xf32>
    %c1 = arith.constant 1 : index
    %c0_5 = arith.constant 0 : index
    %3 = vector.load %arg2[%c1, %c0_5] : memref<32x128xf32, #tpu.memory_space<vmem>>, vector<1x27xf32>
    %c8 = arith.constant 8 : index
    %c0_6 = arith.constant 0 : index
    %4 = vector.load %arg2[%c8, %c0_6] : memref<32x128xf32, #tpu.memory_space<vmem>>, vector<12x128xf32>
    %c20 = arith.constant 20 : index
    %c0_7 = arith.constant 0 : index
    %5 = vector.load %arg2[%c20, %c0_7] : memref<32x128xf32, #tpu.memory_space<vmem>>, vector<2x128xf32>
    %c24 = arith.constant 24 : index
    %c0_8 = arith.constant 0 : index
    %6 = vector.load %arg2[%c24, %c0_8] : memref<32x128xf32, #tpu.memory_space<vmem>>, vector<1x128xf32>
    %7 = vector.broadcast %2 : vector<1x27xf32> to vector<12x27xf32>
    %8 = arith.mulf %0, %7 : vector<12x27xf32>
    %cst = arith.constant dense<0.000000e+00> : vector<12xf32>
    %9 = vector.multi_reduction <add>, %8, %cst [1] : vector<12x27xf32> to vector<12xf32>
    %10 = vector.shape_cast %9 : vector<12xf32> to vector<12x1xf32>
    %11 = vector.broadcast %3 : vector<1x27xf32> to vector<2x27xf32>
    %12 = arith.mulf %1, %11 : vector<2x27xf32>
    %cst_9 = arith.constant dense<0.000000e+00> : vector<2xf32>
    %13 = vector.multi_reduction <add>, %12, %cst_9 [1] : vector<2x27xf32> to vector<2xf32>
    %14 = vector.shape_cast %13 : vector<2xf32> to vector<2x1xf32>
    %15 = vector.broadcast %10 : vector<12x1xf32> to vector<12x128xf32>
    %16 = arith.mulf %15, %4 : vector<12x128xf32>
    %cst_10 = arith.constant dense<0.000000e+00> : vector<128xf32>
    %17 = vector.multi_reduction <add>, %16, %cst_10 [0] : vector<12x128xf32> to vector<128xf32>
    %18 = vector.shape_cast %17 : vector<128xf32> to vector<1x128xf32>
    %19 = vector.broadcast %14 : vector<2x1xf32> to vector<2x128xf32>
    %20 = arith.mulf %19, %5 : vector<2x128xf32>
    %cst_11 = arith.constant dense<0.000000e+00> : vector<128xf32>
    %21 = vector.multi_reduction <add>, %20, %cst_11 [0] : vector<2x128xf32> to vector<128xf32>
    %22 = vector.shape_cast %21 : vector<128xf32> to vector<1x128xf32>
    %23 = arith.addf %18, %22 : vector<1x128xf32>
    %24 = arith.addf %23, %6 : vector<1x128xf32>
    %25 = vector.shape_cast %24 : vector<1x128xf32> to vector<1x1x128xf32>
    %cst_12 = arith.constant dense<0xFF800000> : vector<1xf32>
    %26 = vector.multi_reduction <maximumf>, %25, %cst_12 [1, 2] : vector<1x1x128xf32> to vector<1xf32>
    %27 = vector.shape_cast %26 : vector<1xf32> to vector<1x1x1xf32>
    %28 = vector.extract %27[0, 0, 0] : f32 from vector<1x1x1xf32>
    %29 = vector.broadcast %28 : f32 to vector<1x128xf32>
    %30 = arith.subf %24, %29 : vector<1x128xf32>
    %31 = math.exp %30 : vector<1x128xf32>
    %32 = vector.shape_cast %31 : vector<1x128xf32> to vector<1x1x128xf32>
    %cst_13 = arith.constant dense<0.000000e+00> : vector<1xf32>
    %33 = vector.multi_reduction <add>, %32, %cst_13 [1, 2] : vector<1x1x128xf32> to vector<1xf32>
    %34 = vector.shape_cast %33 : vector<1xf32> to vector<1x1x1xf32>
    %35 = vector.extract %34[0, 0, 0] : f32 from vector<1x1x1xf32>
    %cst_14 = arith.constant 1.000000e+00 : f32
    %36 = arith.divf %cst_14, %35 : f32
    %37 = vector.broadcast %36 : f32 to vector<1x128xf32>
    %38 = arith.mulf %31, %37 : vector<1x128xf32>
    %c0_15 = arith.constant 0 : index
    %c0_16 = arith.constant 0 : index
    %39 = vector.load %arg3[%c0_15, %c0_16] : memref<1x128xf32, #tpu.memory_space<vmem>>, vector<1x128xf32>
    tpu.vector_store %arg3[%c0_15, %c0_16], %38 {strides = array<i32>} : memref<1x128xf32, #tpu.memory_space<vmem>>, vector<1x128xf32>,
    return
  }
}

</mosaic_0001>

<bundles_post_ra>
// kernel: node_predictor_forward.1
= control target key start
LH: loop header
LB: loop body
LE: loop exit
PB: predicated region body
PF: predicated region fallthrough
CT: control target
= control target key end

     0   :  { %8 = vsyncpa [#allocation3], 0  ;;  %s330_s0 = inlined_call_operand.hbm [shape: f32[12,27], index: 0, kind: input, shape index: {}]   ;;  %s331_s1 = inlined_call_operand.hbm [shape: f32[2,27], index: 1, kind: input, shape index: {}]   ;;  %s332_s2 = inlined_call_operand.hbm [shape: f32[32,128], index: 2, kind: input, shape index: {}]   ;;  %s333_s3 = inlined_call_operand.hbm [shape: f32[1,128], index: 3, kind: output, shape index: {}]  }
   0x1   :  { %9 = vsyncpa [#allocation6], 0  ;;  %s29_s14 = sshll.u32 %s331_s1, 4  ;;  %s30_s14 = int_to_ptr.hbm [resolvable:$true] %s29_s14 }
   0x2   :  { %10 = vsyncpa [#allocation4], 0  ;;  %s290_s15 = smov [#allocation5]   ;;  %s15_s19 = sshll.u32 %s330_s0, 4  ;;  %s16_s19 = int_to_ptr.hbm [resolvable:$true] %s15_s19 }
   0x3   :  { %s31_s16 = sshll.u32 %s290_s15, 4  ;;  %s291_s20 = smov [#allocation2]   ;;  %s32_s16 = int_to_ptr.vmem [resolvable:$true] %s31_s16 }
   0x4   :  { %34 = dma.hbm_to_vmem [thread:$0]  %s30_s14, 32, %s32_s16, [#allocation6]  }
   0x5   :  { %s17_s21 = sshll.u32 %s291_s20, 4  ;;  %s292_s22 = smov 128   ;;  %s18_s21 = int_to_ptr.vmem [resolvable:$true] %s17_s21 }
   0x6   :  { %s293_s23 = smov 8   ;;  %s39_s1 = sshll.u32 %s332_s2, 4  ;;  %s40_s1 = int_to_ptr.hbm [resolvable:$true] %s39_s1 }
   0x7   :  { %23 = dma.hbm_to_vmem [thread:$0]  %s16_s19, 256, %s18_s21, [#allocation3], %s292_s22, %s292_s22, %s293_s23  }
   0x8   :  { %s294_s26 = smov [#allocation7]  }
   0x9   :  { %s41_s27 = sshll.u32 %s294_s26, 4  ;;  %s42_s27 = int_to_ptr.vmem [resolvable:$true] %s41_s27 }
   0xa   :  { %47 = dma.hbm_to_vmem [thread:$0]  %s40_s1, 512, %s42_s27, [#allocation6], %s292_s22, %s292_s22, %s293_s23  }
   0xb   :  { %284 = dma.done.wait [#allocation3], 256  }
   0xc   :  { %285 = vsyncadd [#allocation3], 4294967040 }
   0xd   :  { %286 = dma.done.wait [#allocation6], 544  }
   0xe   :  { %287 = vsyncadd [#allocation6], 4294966752  ;;  %vm76_vm0 = vcmask 216064   ;;  %v61_v0 = vld [vmem:[#allocation2 + $0x8] sm:$0xf]  ;;  %vm82_vm1 = vcmask 214016  }
   0xf   :  { %v182_v1 = vld [vmem:[#allocation7] ss:$0 sm:$0xff]  ;;  %v62_v2 = vld [vmem:[#allocation5] sm:$0x3]  ;;  %v183_v3 = vld [vmem:[#allocation7 + $0x1] ss:$0 sm:$0xff] }
  0x10   :  { %v71_v4 = vmul.f32 %v182_v1, %v61_v0  ;;  %v81_v5 = vmul.f32 %v183_v3, %v62_v2  ;;  %v60_v6 = vld [vmem:[#allocation2] sm:$0xff]  ;;  %vm72_vm2 = vcmask 220160   ;;  %vm98_vm3 = vcmask 1041408   ;;  %v68_v35 = vld [vmem:[#allocation7 + $0x18] sm:$0x1]  ;;  %s295_s28 = smov [#allocation8]  }
  0x11   :  { %v70_v9 = vmul.f32 %v182_v1, %v60_v6  ;;  %v67_v11 = vld [vmem:[#allocation7 + $0x14] sm:$0x3]  ;;  %v66_v15 = vld [vmem:[#allocation7 + $0x10] sm:$0xf]  ;;  %v65_v19 = vld [vmem:[#allocation7 + $0x8] sm:$0xff]  ;;  %vm88_vm4 = vcmask 1043456  }
  0x12   :  { %v77_v7 = vsel %vm76_vm0, %v71_v4, 0.0  ;;  %v83_v8 = vsel %vm82_vm1, %v81_v5, 0.0  ;;  %vm108_vm5 = vcmask 1040384   ;;  %s157_s29 = sshll.u32 %s295_s28, 4  ;;  %s159_s5 = sshll.u32 %s333_s3, 4  ;;  %s158_s29 = int_to_ptr.vmem [resolvable:$true] %s157_s29  ;;  %s160_s5 = int_to_ptr.hbm [resolvable:$true] %s159_s5 }
  0x13   :  { %78 = vadd.xlane.f32.xlu0 %v77_v7  ;;  %84 = vadd.xlane.f32.xlu1 %v83_v8  ;;  %v73_v10 = vsel %vm72_vm2, %v70_v9, 0.0 }
  0x1b   :  { %74 = vadd.xlane.f32.xlu0 %v73_v10 }
  0x86   :  { %v79_v12 = vpop.xlane.xlu0 %78  ;;  %v85_v13 = vpop.xlane.xlu1 %84 }
  0x87   :  { %v97_v14 = vmul.f32 %v85_v13, %v67_v11  ;;  %v87_v18 = vmul.f32 %v79_v12, %v66_v15 }
  0x89   :  { %v99_v16 = vsel %vm98_vm3, %v97_v14, 0.0  ;;  %v89_v23 = vsel %vm88_vm4, %v87_v18, 0.0 }
  0x8a   :  { %v100_v17 = vrot.slane %v99_v16, 4 }
  0x8c   :  { %v101_v20 = vadd.f32 %v100_v17, %v99_v16 }
  0x8e   :  { %v75_v21 = vpop.xlane.xlu0 %74  ;;  %v102_v24 = vrot.slane %v101_v20, 2 }
  0x8f   :  { %v86_v22 = vmul.f32 %v75_v21, %v65_v19 }
  0x90   :  { %v103_v27 = vadd.f32 %v102_v24, %v101_v20 }
  0x91   :  { %v90_v25 = vadd.f32 %v89_v23, %v86_v22 }
  0x92   :  { %v104_v30 = vrot.slane %v103_v27, 1 }
  0x93   :  { %v91_v26 = vrot.slane %v90_v25, 4 }
  0x94   :  { %v105_v34 = vadd.f32 %v104_v30, %v103_v27 }
  0x95   :  { %v92_v28 = vadd.f32 %v91_v26, %v90_v25 }
  0x97   :  { %v93_v29 = vrot.slane %v92_v28, 2 }
  0x99   :  { %v94_v31 = vadd.f32 %v93_v29, %v92_v28 }
  0x9b   :  { %v95_v32 = vrot.slane %v94_v31, 1 }
  0x9d   :  { %v96_v33 = vadd.f32 %v95_v32, %v94_v31 }
  0x9f   :  { %v106_v36 = vadd.f32 %v105_v34, %v96_v33 }
  0xa1   :  { %v107_v37 = vadd.f32 %v106_v36, %v68_v35 }
  0xa3   :  { %v109_v38 = vsel %vm108_vm5, %v107_v37, -inf }
  0xa4   :  { %110 = vmax.xlane.f32.xlu1 %v109_v38 }
 0x117   :  { %v111_v39 = vpop.xlane.xlu1 %110 }
 0x118   :  { %v112_v40 = vrot.slane %v111_v39, 4 }
 0x11a   :  { %v113_v41 = vmax.f32 %v111_v39, %v112_v40 }
 0x11c   :  { %v114_v42 = vrot.slane %v113_v41, 2 }
 0x11e   :  { %v115_v43 = vmax.f32 %v113_v41, %v114_v42 }
 0x120   :  { %v116_v44 = vrot.slane %v115_v43, 1 }
 0x122   :  { %v117_v45 = vmax.f32 %v115_v43, %v116_v44 }
 0x124   :  { %170 = vpush %v117_v45 }
 0x155   :  { %s171_s0 = spop %170 }
 0x156   :  { %v119_v46 = vstv %s171_s0 }
 0x157   :  { %v120_v47 = vsub.f32 %v107_v37, %v119_v46 }
 0x159   :  { %v121_v48 = vmul.f32 1.442695, %v120_v47 }
 0x15b   :  { %184 = vpow2.f32 %v121_v48 }
 0x161   :  { %v185_v49 = vpop.eup %184 }
 0x162   :  { %v123_v50 = vsel %vm108_vm5, %v185_v49, 0.0 }
 0x163   :  { %124 = vadd.xlane.f32.xlu2 %v123_v50 }
 0x1d6   :  { %v125_v51 = vpop.xlane.xlu2 %124 }
 0x1d7   :  { %v126_v52 = vrot.slane %v125_v51, 4 }
 0x1d9   :  { %v127_v53 = vadd.f32 %v126_v52, %v125_v51 }
 0x1db   :  { %v128_v54 = vrot.slane %v127_v53, 2 }
 0x1dd   :  { %v129_v55 = vadd.f32 %v128_v54, %v127_v53 }
 0x1df   :  { %v130_v56 = vrot.slane %v129_v55, 1 }
 0x1e1   :  { %v131_v57 = vadd.f32 %v130_v56, %v129_v55 }
 0x1e3   :  { %172 = vpush %v131_v57 }
 0x214   :  { %s173_s2 = spop %172 }
 0x215   :  { %v133_v58 = vstv %s173_s2 }
 0x216   :  { %186 = vrcp.f32 %v133_v58  ;;  %v145_v62 = vand.u32 2147483648, %v133_v58  ;;  %v143_v0 = vand.u32 2147483647, %v133_v58  ;;  %vm139_vm7 = vweird.f32 %v133_v58 }
 0x218   :  { %v146_v2 = vor.u32 1.1754944e-38, %v145_v62  ;;  %vm144_vm9 = vcmp.eq.f32.partialorder %v143_v0, 8.507059e+37 }
 0x21c   :  { %v187_v59 = vpop.eup %186 }
 0x21d   :  { %v135_v60 = vmul.f32 %v187_v59, %v133_v58  ;;  %vm140_vm6 = vweird.f32 %v187_v59 }
 0x21e   :  { %vm141_vm8 = vmor %vm139_vm7, %vm140_vm6 }
 0x21f   :  { %v136_v61 = vsub.f32 1.0, %v135_v60 }
 0x221   :  { %v137_v63 = vmul.f32 %v187_v59, %v136_v61 }
 0x223   :  { %v138_v1 = vadd.f32 %v187_v59, %v137_v63 }
 0x225   :  { %v142_v3 = vsel %vm141_vm8, %v187_v59, %v138_v1 }
 0x226   :  { %v147_v4 = vsel %vm144_vm9, %v146_v2, %v142_v3 }
 0x227   :  { %174 = vpush %v147_v4 }
 0x258   :  { %s175_s6 = spop %174 }
 0x259   :  { %v149_v5 = vstv %s175_s6 }
 0x25a   :  { %v150_v6 = vmul.f32 %v185_v49, %v149_v5 }
 0x25c   :  { %151 = vst [vmem:[#allocation8] sm:$0x1] %v150_v6 }
 0x25d   :  { %162 = dma.vmem_to_hbm [thread:$0]  %s158_s29, 16, %s160_s5, [#allocation4]  }
 0x25e   :  { %288 = dma.done.wait [#allocation4], 16  }
 0x25f   :  { %289 = vsyncadd [#allocation4], 4294967280 }
 0x260   :  { %167 = vsyncpa [#allocation3], 1 }
 0x261   :  { %168 = vsyncpa [#allocation6], 1 }
 0x262   :  { %169 = vsyncpa [#allocation4], 1 }

</bundles_post_ra>
